<compile_context>
chip_gen: v7x
topology: tpu7x:2x2x1
jax: 0.10.0
libtpu: 0.0.40
codegen_flags: <defaults>
</compile_context>

<pallas_src>
import functools
import math

import jax
import jax.numpy as jnp
from jax.experimental import pallas as pl
from jax.experimental.pallas import tpu as pltpu

_MIB = 1024 * 1024


# ----------------------------------------------------------------------------
# Kernel
# ----------------------------------------------------------------------------
def _ffn_kernel(*refs, num_layers):
    """refs = (t, x, w0_t, w0_x, b0, w1, b1, ..., w_{L-1}, b_{L-1}, out)."""
    t_ref, x_ref = refs[0], refs[1]
    p = refs[2:-1]
    o_ref = refs[-1]

    w0t, w0x, b0 = p[0], p[1], p[2]
    cdt = w0t.dtype  # matmul-input dtype (f32 or bf16); accumulation is f32
    h = (jnp.dot(t_ref[...].astype(cdt), w0t[...],
                 preferred_element_type=jnp.float32)
         + jnp.dot(x_ref[...].astype(cdt), w0x[...],
                   preferred_element_type=jnp.float32)
         + b0[...].astype(jnp.float32))
    if num_layers > 1:  # ReLU after every Linear except the last (Identity)
        h = jnp.maximum(h, 0.0)

    for j in range(1, num_layers):
        w = p[3 + 2 * (j - 1)]
        b = p[4 + 2 * (j - 1)]
        h = (jnp.dot(h.astype(w.dtype), w[...],
                     preferred_element_type=jnp.float32)
             + b[...].astype(jnp.float32))
        if j < num_layers - 1:
            h = jnp.maximum(h, 0.0)

    o_ref[...] = h.astype(o_ref.dtype)


# ----------------------------------------------------------------------------
# Parameters
# ----------------------------------------------------------------------------
def init_ffn_params(sizes, key):
    """nn.Linear-style init: U(-1/sqrt(fan_in), 1/sqrt(fan_in)); weights [in, out]."""
    params = []
    for j in range(len(sizes) - 1):
        fan_in, fan_out = sizes[j], sizes[j + 1]
        key, kw, kb = jax.random.split(key, 3)
        bound = 1.0 / math.sqrt(fan_in)
        w = jax.random.uniform(kw, (fan_in, fan_out), jnp.float32, -bound, bound)
        b = jax.random.uniform(kb, (1, fan_out), jnp.float32, -bound, bound)
        params.append((w, b))
    return params


def prepare_ffn_params(params, t_dim, weight_dtype=jnp.float32):
    """One-time prep (hoisted out of the forward pass): split the first-layer
    weight along its input axis into (t, x) parts and cast weights to
    `weight_dtype` (bf16 recommended on v6e/v7x). Biases stay f32 — they are
    added into the f32 accumulator."""
    w0, b0 = params[0]
    flat = [jnp.asarray(w0[:t_dim, :], weight_dtype),
            jnp.asarray(w0[t_dim:, :], weight_dtype),
            jnp.asarray(b0, jnp.float32)]
    for w, b in params[1:]:
        flat.append(jnp.asarray(w, weight_dtype))
        flat.append(jnp.asarray(b, jnp.float32))
    return flat


# ----------------------------------------------------------------------------
# Forward
# ----------------------------------------------------------------------------
def _vmem_bytes_estimate(flat_params, tb, t_dim, x_dim, out_dim):
    p_bytes = sum(int(a.size) * a.dtype.itemsize for a in flat_params)
    widths = [flat_params[0].shape[1]]
    widths += [flat_params[i].shape[1] for i in range(3, len(flat_params), 2)]
    max_w = max(widths + [out_dim])
    act_bytes = 2 * tb * (t_dim + x_dim) * 4   # double-buffered input tiles
    out_bytes = 2 * tb * out_dim * 4           # double-buffered output tile
    inter_bytes = 2 * tb * max_w * 4           # f32 intermediate h (headroom)
    return 2 * p_bytes + act_bytes + out_bytes + inter_bytes


def ffn_forward(t, x, flat_params, *, block_b=512):
    """Pallas-backed equivalent of FFN.forward(t, x).

    flat_params: output of prepare_ffn_params (w0_t, w0_x, b0, w1, b1, ...).
    """
    B, t_dim = t.shape
    _, x_dim = x.shape
    num_layers = (len(flat_params) - 1) // 2
    out_dim = flat_params[-1].shape[1]

    # Batch tile: as large as fits a conservative VMEM budget (v7x: 64 MiB
    # physical). Multiple of 8 sublanes when it does not cover the full batch.
    tb = min(block_b, B)
    if tb < B:
        tb = max(8, (tb // 8) * 8)
    while tb > 8 and _vmem_bytes_estimate(flat_params, tb, t_dim, x_dim,
                                          out_dim) > 40 * _MIB:
        tb = max(8, tb // 2)
    grid = (pl.cdiv(B, tb),)

    # t / x / out are tiled over batch; weights & biases use a constant
    # index_map so they are loaded once and stay resident in VMEM.
    in_specs = [
        pl.BlockSpec((tb, t_dim), lambda i: (i, 0)),
        pl.BlockSpec((tb, x_dim), lambda i: (i, 0)),
    ]
    for a in flat_params:
        in_specs.append(pl.BlockSpec(a.shape, lambda i: (0, 0)))
    out_specs = pl.BlockSpec((tb, out_dim), lambda i: (i, 0))

    # Advisory cost estimate for XLA scheduling around the custom call.
    layer_dims = []
    in_w = t_dim + x_dim
    for j in range(num_layers):
        w = flat_params[0] if j == 0 else flat_params[3 + 2 * (j - 1)]
        layer_dims.append((in_w, int(w.shape[1])))
        in_w = int(w.shape[1])
    flops = 2 * B * sum(k * n for k, n in layer_dims)
    bytes_accessed = (int(t.size) * t.dtype.itemsize
                      + int(x.size) * x.dtype.itemsize
                      + sum(int(a.size) * a.dtype.itemsize for a in flat_params)
                      + B * out_dim * t.dtype.itemsize)
    cost = pl.CostEstimate(flops=flops, transcendentals=0,
                           bytes_accessed=bytes_accessed)

    vmem_limit = int(min(
        48 * _MIB,
        max(32 * _MIB,
            _vmem_bytes_estimate(flat_params, tb, t_dim, x_dim, out_dim))))

    kernel = functools.partial(_ffn_kernel, num_layers=num_layers)
    return pl.pallas_call(
        kernel,
        out_shape=jax.ShapeDtypeStruct((B, out_dim), t.dtype),
        grid=grid,
        in_specs=in_specs,
        out_specs=out_specs,
        compiler_params=pltpu.CompilerParams(
            # independent batch tiles -> sharded across both TCs on v7x
            dimension_semantics=("parallel",),
            vmem_limit_bytes=vmem_limit),
        cost_estimate=cost,
    )(t, x, *flat_params)


# ----------------------------------------------------------------------------
# References (pure jnp)
# ----------------------------------------------------------------------------
def _ffn_reference(t, x, params):
    """Matches the PyTorch module semantics (f32 throughout)."""
    h = jnp.concatenate([t, x], axis=1)
    L = len(params)
    for j, (w, b) in enumerate(params):
        h = h @ w + b
        if j < L - 1:
            h = jnp.maximum(h, 0.0)
    return h


def _ffn_reference_flat(t, x, flat_params):
    """Mirrors the kernel compute path (split first layer, cast matmul inputs
    to the weight dtype, f32 accumulation)."""
    num_layers = (len(flat_params) - 1) // 2
    w0t, w0x, b0 = flat_params[0], flat_params[1], flat_params[2]
    cdt = w0t.dtype
    h = (jnp.dot(t.astype(cdt), w0t, preferred_element_type=jnp.float32)
         + jnp.dot(x.astype(cdt), w0x, preferred_element_type=jnp.float32)
         + b0.astype(jnp.float32))
    if num_layers > 1:
        h = jnp.maximum(h, 0.0)
    for j in range(1, num_layers):
        w = flat_params[3 + 2 * (j - 1)]
        b = flat_params[4 + 2 * (j - 1)]
        h = (jnp.dot(h.astype(w.dtype), w, preferred_element_type=jnp.float32)
             + b.astype(jnp.float32))
        if j < num_layers - 1:
            h = jnp.maximum(h, 0.0)
    return h


if __name__ == "__main__":
    key = jax.random.PRNGKey(0)
    k_t, k_x, k_p, k_t2, k_x2 = jax.random.split(key, 5)

    t_dim, x_dim = 4, 12
    sizes = [t_dim + x_dim, 32, 32, 8]     # [in_dim, hidden, hidden, out_dim]
    params = init_ffn_params(sizes, k_p)

    # --- Test 1: module-sized shapes, f32 weights, strict check vs reference.
    B = 8
    t = jax.random.normal(k_t, (B, t_dim), jnp.float32)
    x = jax.random.normal(k_x, (B, x_dim), jnp.float32)
    flat_f32 = prepare_ffn_params(params, t_dim, weight_dtype=jnp.float32)
    out = jax.block_until_ready(ffn_forward(t, x, flat_f32))
    ref = _ffn_reference(t, x, params)
    assert out.shape == (B, sizes[-1])
    assert jnp.allclose(out, ref, atol=1e-5, rtol=1e-5), \
        float(jnp.max(jnp.abs(out - ref)))

    # --- Test 2: larger batch exercises the batch-tiled pipeline (2 grid
    #     steps, weights resident) with bf16 weights feeding the MXU.
    B2 = 512
    t2 = jax.random.normal(k_t2, (B2, t_dim), jnp.float32)
    x2 = jax.random.normal(k_x2, (B2, x_dim), jnp.float32)
    flat_bf16 = prepare_ffn_params(params, t_dim, weight_dtype=jnp.bfloat16)
    out2 = jax.block_until_ready(ffn_forward(t2, x2, flat_bf16, block_b=256))
    ref2 = _ffn_reference_flat(t2, x2, flat_bf16)
    assert out2.shape == (B2, sizes[-1])
    assert jnp.allclose(out2, ref2, atol=5e-3, rtol=5e-3), \
        float(jnp.max(jnp.abs(out2 - ref2)))

    print("KERNEL_OK")
</pallas_src>

<mosaic_0001>
module attributes {stable_mosaic.version = 11 : i64} {
  func.func @_ffn_kernel(%arg0: i32, %arg1: memref<8x4xf32, #tpu.memory_space<vmem>>, %arg2: memref<8x12xf32, #tpu.memory_space<vmem>>, %arg3: memref<4x32xf32, #tpu.memory_space<vmem>>, %arg4: memref<12x32xf32, #tpu.memory_space<vmem>>, %arg5: memref<1x32xf32, #tpu.memory_space<vmem>>, %arg6: memref<32x32xf32, #tpu.memory_space<vmem>>, %arg7: memref<1x32xf32, #tpu.memory_space<vmem>>, %arg8: memref<32x8xf32, #tpu.memory_space<vmem>>, %arg9: memref<1x8xf32, #tpu.memory_space<vmem>>, %arg10: memref<8x8xf32, #tpu.memory_space<vmem>>) attributes {dimension_semantics = [#tpu.dimension_semantics<parallel>], iteration_bounds = array<i64: 1>, scalar_prefetch = 0 : i64, scratch_operands = 0 : i64, tpu.core_type = #tpu.core_type<tc>, window_params = [{transform_indices = @transform_0, window_bounds = array<i64: 8, 4>}, {transform_indices = @transform_1, window_bounds = array<i64: 8, 12>}, {pipeline_mode = #tpu.pipeline_mode<synchronous>, transform_indices = @transform_2, window_bounds = array<i64: 4, 32>}, {pipeline_mode = #tpu.pipeline_mode<synchronous>, transform_indices = @transform_3, window_bounds = array<i64: 12, 32>}, {pipeline_mode = #tpu.pipeline_mode<synchronous>, transform_indices = @transform_4, window_bounds = array<i64: 1, 32>}, {pipeline_mode = #tpu.pipeline_mode<synchronous>, transform_indices = @transform_5, window_bounds = array<i64: 32, 32>}, {pipeline_mode = #tpu.pipeline_mode<synchronous>, transform_indices = @transform_6, window_bounds = array<i64: 1, 32>}, {pipeline_mode = #tpu.pipeline_mode<synchronous>, transform_indices = @transform_7, window_bounds = array<i64: 32, 8>}, {pipeline_mode = #tpu.pipeline_mode<synchronous>, transform_indices = @transform_8, window_bounds = array<i64: 1, 8>}, {transform_indices = @transform_9, window_bounds = array<i64: 8, 8>}]} {
    %c0 = arith.constant 0 : index
    %c0_0 = arith.constant 0 : index
    %0 = vector.load %arg1[%c0, %c0_0] : memref<8x4xf32, #tpu.memory_space<vmem>>, vector<8x4xf32>
    %c0_1 = arith.constant 0 : index
    %c0_2 = arith.constant 0 : index
    %1 = vector.load %arg3[%c0_1, %c0_2] : memref<4x32xf32, #tpu.memory_space<vmem>>, vector<4x32xf32>
    %cst = arith.constant dense<0.000000e+00> : vector<8x32xf32>
    %2 = tpu.matmul %0, %1, %cst {dimension_numbers = #tpu.dot_dimension_numbers<[1], [0], [0], [1], [0, 0, 1, 1], [], []>} : vector<8x4xf32>, vector<4x32xf32>, vector<8x32xf32> -> vector<8x32xf32>
    %c0_3 = arith.constant 0 : index
    %c0_4 = arith.constant 0 : index
    %3 = vector.load %arg2[%c0_3, %c0_4] : memref<8x12xf32, #tpu.memory_space<vmem>>, vector<8x12xf32>
    %c0_5 = arith.constant 0 : index
    %c0_6 = arith.constant 0 : index
    %4 = vector.load %arg4[%c0_5, %c0_6] : memref<12x32xf32, #tpu.memory_space<vmem>>, vector<12x32xf32>
    %cst_7 = arith.constant dense<0.000000e+00> : vector<8x32xf32>
    %5 = tpu.matmul %3, %4, %cst_7 {dimension_numbers = #tpu.dot_dimension_numbers<[1], [0], [0], [1], [0, 0, 1, 1], [], []>} : vector<8x12xf32>, vector<12x32xf32>, vector<8x32xf32> -> vector<8x32xf32>
    %6 = arith.addf %2, %5 : vector<8x32xf32>
    %c0_8 = arith.constant 0 : index
    %c0_9 = arith.constant 0 : index
    %7 = vector.load %arg5[%c0_8, %c0_9] : memref<1x32xf32, #tpu.memory_space<vmem>>, vector<1x32xf32>
    %8 = vector.broadcast %7 : vector<1x32xf32> to vector<8x32xf32>
    %9 = arith.addf %6, %8 : vector<8x32xf32>
    %cst_10 = arith.constant 0.000000e+00 : f32
    %10 = vector.broadcast %cst_10 : f32 to vector<8x32xf32>
    %11 = arith.maximumf %9, %10 : vector<8x32xf32>
    %c0_11 = arith.constant 0 : index
    %c0_12 = arith.constant 0 : index
    %12 = vector.load %arg6[%c0_11, %c0_12] : memref<32x32xf32, #tpu.memory_space<vmem>>, vector<32x32xf32>
    %cst_13 = arith.constant dense<0.000000e+00> : vector<8x32xf32>
    %13 = tpu.matmul %11, %12, %cst_13 {dimension_numbers = #tpu.dot_dimension_numbers<[1], [0], [0], [1], [0, 0, 1, 1], [], []>} : vector<8x32xf32>, vector<32x32xf32>, vector<8x32xf32> -> vector<8x32xf32>
    %c0_14 = arith.constant 0 : index
    %c0_15 = arith.constant 0 : index
    %14 = vector.load %arg7[%c0_14, %c0_15] : memref<1x32xf32, #tpu.memory_space<vmem>>, vector<1x32xf32>
    %15 = vector.broadcast %14 : vector<1x32xf32> to vector<8x32xf32>
    %16 = arith.addf %13, %15 : vector<8x32xf32>
    %cst_16 = arith.constant 0.000000e+00 : f32
    %17 = vector.broadcast %cst_16 : f32 to vector<8x32xf32>
    %18 = arith.maximumf %16, %17 : vector<8x32xf32>
    %c0_17 = arith.constant 0 : index
    %c0_18 = arith.constant 0 : index
    %19 = vector.load %arg8[%c0_17, %c0_18] : memref<32x8xf32, #tpu.memory_space<vmem>>, vector<32x8xf32>
    %cst_19 = arith.constant dense<0.000000e+00> : vector<8x8xf32>
    %20 = tpu.matmul %18, %19, %cst_19 {dimension_numbers = #tpu.dot_dimension_numbers<[1], [0], [0], [1], [0, 0, 1, 1], [], []>} : vector<8x32xf32>, vector<32x8xf32>, vector<8x8xf32> -> vector<8x8xf32>
    %c0_20 = arith.constant 0 : index
    %c0_21 = arith.constant 0 : index
    %21 = vector.load %arg9[%c0_20, %c0_21] : memref<1x8xf32, #tpu.memory_space<vmem>>, vector<1x8xf32>
    %22 = vector.broadcast %21 : vector<1x8xf32> to vector<8x8xf32>
    %23 = arith.addf %20, %22 : vector<8x8xf32>
    %c0_22 = arith.constant 0 : index
    %c0_23 = arith.constant 0 : index
    %24 = vector.load %arg10[%c0_22, %c0_23] : memref<8x8xf32, #tpu.memory_space<vmem>>, vector<8x8xf32>
    tpu.vector_store %arg10[%c0_22, %c0_23], %23 {strides = array<i32>} : memref<8x8xf32, #tpu.memory_space<vmem>>, vector<8x8xf32>,
    return
  }
  func.func @transform_0(%arg0: i32) -> (i32, i32) {
    %c0_i32 = arith.constant 0 : i32
    %c0_i32_0 = arith.constant 0 : i32
    return %arg0, %c0_i32 : i32, i32
  }
  func.func @transform_1(%arg0: i32) -> (i32, i32) {
    %c0_i32 = arith.constant 0 : i32
    %c0_i32_0 = arith.constant 0 : i32
    return %arg0, %c0_i32 : i32, i32
  }
  func.func @transform_2(%arg0: i32) -> (i32, i32) {
    %c0_i32 = arith.constant 0 : i32
    %c0_i32_0 = arith.constant 0 : i32
    %c0_i32_1 = arith.constant 0 : i32
    return %c0_i32, %c0_i32_0 : i32, i32
  }
  func.func @transform_3(%arg0: i32) -> (i32, i32) {
    %c0_i32 = arith.constant 0 : i32
    %c0_i32_0 = arith.constant 0 : i32
    %c0_i32_1 = arith.constant 0 : i32
    return %c0_i32, %c0_i32_0 : i32, i32
  }
  func.func @transform_4(%arg0: i32) -> (i32, i32) {
    %c0_i32 = arith.constant 0 : i32
    %c0_i32_0 = arith.constant 0 : i32
    %c0_i32_1 = arith.constant 0 : i32
    return %c0_i32, %c0_i32_0 : i32, i32
  }
  func.func @transform_5(%arg0: i32) -> (i32, i32) {
    %c0_i32 = arith.constant 0 : i32
    %c0_i32_0 = arith.constant 0 : i32
    %c0_i32_1 = arith.constant 0 : i32
    return %c0_i32, %c0_i32_0 : i32, i32
  }
  func.func @transform_6(%arg0: i32) -> (i32, i32) {
    %c0_i32 = arith.constant 0 : i32
    %c0_i32_0 = arith.constant 0 : i32
    %c0_i32_1 = arith.constant 0 : i32
    return %c0_i32, %c0_i32_0 : i32, i32
  }
  func.func @transform_7(%arg0: i32) -> (i32, i32) {
    %c0_i32 = arith.constant 0 : i32
    %c0_i32_0 = arith.constant 0 : i32
    %c0_i32_1 = arith.constant 0 : i32
    return %c0_i32, %c0_i32_0 : i32, i32
  }
  func.func @transform_8(%arg0: i32) -> (i32, i32) {
    %c0_i32 = arith.constant 0 : i32
    %c0_i32_0 = arith.constant 0 : i32
    %c0_i32_1 = arith.constant 0 : i32
    return %c0_i32, %c0_i32_0 : i32, i32
  }
  func.func @transform_9(%arg0: i32) -> (i32, i32) {
    %c0_i32 = arith.constant 0 : i32
    %c0_i32_0 = arith.constant 0 : i32
    return %arg0, %c0_i32 : i32, i32
  }
}

</mosaic_0001>

<bundles_post_ra>
// kernel: tpu_custom_call.1
= control target key start
LH: loop header
LB: loop body
LE: loop exit
PB: predicated region body
PF: predicated region fallthrough
CT: control target
= control target key end

     0   :  { %14 = vsyncpa [#allocation3], 0  ;;  %s658_s0 = inlined_call_operand.vmem [shape: f32[8,4], index: 0, kind: input, shape index: {}]   ;;  %s659_s1 = inlined_call_operand.vmem [shape: f32[8,12], index: 1, kind: input, shape index: {}]   ;;  %s660_s2 = inlined_call_operand.hbm [shape: f32[4,32], index: 2, kind: input, shape index: {}]   ;;  %s661_s3 = inlined_call_operand.vmem [shape: f32[12,32], index: 3, kind: input, shape index: {}]   ;;  %s662_s4 = inlined_call_operand.vmem [shape: f32[1,32], index: 4, kind: input, shape index: {}]   ;;  %s663_s5 = inlined_call_operand.vmem [shape: f32[32,32], index: 5, kind: input, shape index: {}]   ;;  %s664_s6 = inlined_call_operand.vmem [shape: f32[1,32], index: 6, kind: input, shape index: {}]   ;;  %s665_s7 = inlined_call_operand.vmem [shape: f32[32,8], index: 7, kind: input, shape index: {}]   ;;  %s666_s8 = inlined_call_operand.vmem [shape: f32[1,8], index: 8, kind: input, shape index: {}]   ;;  %s667_s9 = inlined_call_operand.hbm [shape: f32[8,8], index: 9, kind: output, shape index: {}]  }
   0x1   :  { %15 = vsyncpa [#allocation4], 0  ;;  %s529_s30 = smov [#allocation2]   ;;  %s481_s13 = scalar_lea.hbm %s660_s2, 64 }
   0x2   :  { %s26_s10 = sshll.u32 %s529_s30, 4  ;;  %p482_p0 = scmp.ne.s32.totalorder %s660_s2, %s481_s13  ;;  %s27_s10 = int_to_ptr.vmem [resolvable:$true] %s26_s10 }
   0x3   :  { %p485_p1 = scmp.lt.u32.totalorder %s481_s13, %s660_s2 }
   0x5   :  { %p487_p2 = pnand %p485_p1, %p482_p0 }
   0x7   :  { %490 = shalt.err (!%p487_p2)
}
   0x8   :  { %s491_s18 = scalar_lea.vmem %s27_s10, 64  ;;  %p496_p4 = scmp.lt.s32.totalorder %s27_s10, %s27_s10 }
   0x9   :  { %p492_p3 = scmp.ne.s32.totalorder %s27_s10, %s491_s18  ;;  %p497_p5 = scmp.lt.s32.totalorder %s491_s18, %s491_s18 }
   0xb   :  { %p498_p6 = por %p497_p5, %p496_p4 }
   0xd   :  { %p499_p7 = pnand %p498_p6, %p492_p3 }
   0xf   :  { %502 = shalt.err (!%p499_p7)
}
  0x10   :  { %29 = dma.hbm_to_vmem [thread:$0]  %s660_s2, 64, %s27_s10, [#allocation3]  }
  0x11   :  { %525 = dma.done.wait [#allocation3], 64  }
  0x12   :  { %526 = vsyncadd [#allocation3], 4294967232  ;;  %v530_v0 = vmov 0.0|0.0   ;;  %v531_v1 = vmov 0.0   ;;  %vm532_vm0 = vmmov 0   ;;  %vm54_vm1 = vcmask 1043456  }
  0x13   :  { %459 = vmatprep.subr.bf16.mxu0 %v530_v0  ;;  %432 = vmatprep.subr.mxu1 %v531_v1  ;;  %vm533_vm2 = vmmov 1   ;;  %vm128_vm4 = vcmask 31744   ;;  %v48_v2 = vld [vmem:[%s661_s3] sm:$0xff]  ;;  %v49_v3 = vld [vmem:[%s661_s3 + $0x8] sm:$0xf]  ;;  %vm50_vm5 = vcmask 97280  }
  0x14   :  { %434 = vmatprep.mubr.msk.f32.mxu1 %vm532_vm0, %v531_v1  ;;  %429 = vmatprep.mubr.msk.f32.mxu0 %vm532_vm0, %v531_v1  ;;  %vm461_vm3 = vmpackc.low %vm54_vm1, %vm533_vm2  ;;  %v46_v4 = vld [vmem:[#allocation2] sm:$0xf]  ;;  %v460_v5 = vpack.c.bf16 %v49_v3, %v48_v2  ;;  %v45_v6 = vld [vmem:[%s658_s0] sm:$0xff]  ;;  %vm225_vm6 = vcmask 261120   ;;  %s534_s23 = smov [#allocation5]   ;;  %vm384_vm7 = vcmask 64512  }
  0x15   :  { %433 = vmatpush3.msk.msra.mxu1 %vm54_vm1, %v46_v4  ;;  %v47_v7 = vld [vmem:[%s659_s1] sm:$0xff]  ;;  %v215_v9 = vld [vmem:[%s663_s5 + $0x8] sm:$0xff]  ;;  %v216_v11 = vld [vmem:[%s663_s5 + $0x10] sm:$0xff]  ;;  %s392_s24 = sshll.u32 %s534_s23, 4  ;;  %s393_s24 = int_to_ptr.vmem [resolvable:$true] %s392_s24 }
  0x16   :  { %435 = vmatmul.mubr.msk.f32.vlgmr.msra.gmra.mrb[0].mxu1 %vm128_vm4, %v45_v6  ;;  %463 = vmatprep.subr.bf16.mxu1 %v530_v0  ;;  %v214_v8 = vld [vmem:[%s663_s5] sm:$0xff]  ;;  %v217_v12 = vld [vmem:[%s663_s5 + $0x18] sm:$0xff]  ;;  %v301_v15 = vld [vmem:[%s665_s7 + $0x8] sm:$0xff]  ;;  %p508_p9 = scmp.lt.s32.totalorder %s393_s24, %s393_s24 }
  0x17   :  { %462 = vmatpush3.bf16.msk.msra.mxu0 %vm461_vm3, %v460_v5  ;;  %445 = vmatprep.mubr.msk.f32.mxu1 %vm532_vm0, %v531_v1  ;;  %v464_v10 = vpack.c.bf16 %v215_v9, %v214_v8  ;;  %v467_v13 = vpack.c.bf16 %v217_v12, %v216_v11  ;;  %v300_v14 = vld [vmem:[%s665_s7] sm:$0xff]  ;;  %v302_v25 = vld [vmem:[%s665_s7 + $0x10] sm:$0xff]  ;;  %v303_v26 = vld [vmem:[%s665_s7 + $0x18] sm:$0xff]  ;;  %s503_s7 = scalar_lea.vmem %s393_s24, 128 }
  0x18   :  { %469 = vmatprep.subr.bf16.mxu0 %v530_v0  ;;  %v470_v16 = vpack.c.bf16 %v301_v15, %v300_v14  ;;  %v405_v20 = vld [vmem:[%s662_s4] ss:$0 sm:$0xff]  ;;  %v473_v27 = vpack.c.bf16 %v303_v26, %v302_v25  ;;  %p504_p8 = scmp.ne.s32.totalorder %s393_s24, %s503_s7  ;;  %p509_p10 = scmp.lt.s32.totalorder %s503_s7, %s503_s7 }
  0x19   :  { %465 = vmatpush3.bf16.msra.mxu1 %v464_v10  ;;  %v406_v28 = vld [vmem:[%s664_s6] ss:$0 sm:$0xff] }
  0x1a   :  { %430 = vmatmul.mubr.msk.f32.vlgmr.msra.gmra.mrb[0].mxu0 %vm50_vm5, %v47_v7  ;;  %466 = vmatprep.subr.bf16.mxu1 %v530_v0  ;;  %v408_v33 = vld [vmem:[%s666_s8] ss:$0 sm:$0xff]  ;;  %p510_p11 = por %p509_p10, %p508_p9 }
  0x1b   :  { %456 = vmatprep.mubr.msk.f32.mxu0 %vm532_vm0, %v531_v1  ;;  %471 = vmatpush3.bf16.msra.mxu0 %v470_v16 }
  0x1c   :  { %472 = vmatprep.subr.bf16.mxu0 %v530_v0  ;;  %p511_p12 = pnand %p510_p11, %p504_p8 }
  0x1d   :  { %468 = vmatpush3.bf16.msra.mxu1 %v467_v13 }
  0x1f   :  { %474 = vmatpush3.bf16.msra.mxu0 %v473_v27 }
  0xe9   :  { %v201_v17 = vpop.f32.mrb[0].mxu1 }
  0xea   :  { %v436_v18 = vpop.f32.mrb[1].mxu1 }
  0xed   :  { %v124_v19 = vpop.f32.mrb[0].mxu0 }
  0xee   :  { %v202_v21 = vadd.f32 %v201_v17, %v124_v19  ;;  %v431_v22 = vpop.f32.mrb[1].mxu0 }
  0xf0   :  { %v212_v23 = vadd.f32 %v405_v20, %v202_v21 }
  0xf2   :  { %v213_v24 = vmax.f32 %v212_v23, 0.0 }
  0xf4   :  { %446 = vmatmul.mubr.msk.f32.vlgmr.msra.gmra.mrb[2].mxu1 %vm225_vm6, %v213_v24 }
 0x1c7   :  { %v295_v29 = vpop.f32.mrb[2].mxu1 }
 0x1c8   :  { %v296_v30 = vadd.f32 %v406_v28, %v295_v29  ;;  %v447_v31 = vpop.f32.mrb[3].mxu1 }
 0x1ca   :  { %v299_v32 = vmax.f32 %v296_v30, 0.0 }
 0x1cc   :  { %457 = vmatmul.mubr.msk.f32.vlgmr.msra.gmra.mrb[2].mxu0 %vm225_vm6, %v299_v32 }
 0x29f   :  { %v380_v34 = vpop.f32.mrb[2].mxu0 }
 0x2a0   :  { %v381_v35 = vadd.f32 %v408_v33, %v380_v34  ;;  %v458_v36 = vpop.f32.mrb[3].mxu0 }
 0x2a2   :  { %385 = vst.msk [vmem:[#allocation5] sm:$0xff] %vm384_vm7, %v381_v35 }
 0x2a3   :  { %514 = shalt.err (!%p511_p12)
}
 0x2a4   :  { %s515_s26 = scalar_lea.hbm %s667_s9, 128 }
 0x2a5   :  { %p516_p13 = scmp.ne.s32.totalorder %s667_s9, %s515_s26  ;;  %p519_p0 = scmp.lt.u32.totalorder %s515_s26, %s667_s9 }
 0x2a7   :  { %p521_p1 = pnand %p519_p0, %p516_p13 }
 0x2a9   :  { %524 = shalt.err (!%p521_p1)
}
 0x2aa   :  { %395 = dma.vmem_to_hbm [thread:$0]  %s393_s24, 128, %s667_s9, [#allocation4]  }
 0x2ab   :  { %527 = dma.done.wait [#allocation4], 128  }
 0x2ac   :  { %528 = vsyncadd [#allocation4], 4294967168 }
 0x2ad   :  { %399 = vsyncpa [#allocation3], 1 }
 0x2ae   :  { %400 = vsyncpa [#allocation4], 1 }

</bundles_post_ra>
